<compile_context>
chip_gen: v6e
topology: v6e:2x2x1
jax: 0.10.0
libtpu: 0.0.40
codegen_flags: <defaults>
</compile_context>

<pallas_src>
import jax
import jax.numpy as jnp
import numpy as np
from jax.experimental import pallas as pl
from jax.experimental.pallas import tpu as pltpu


def _round_up(x, m):
    return ((x + m - 1) // m) * m


def gru_kernel(tok_ref, emb_ref, wih_ref, bx_ref, whh_ref, bhn_ref, wfc_ref, bfc_ref,
               out_ref, gx_ref):
    """Fused forward: embedding gather + x2h + GRU recurrence + fc + sigmoid.

    tok_ref : (T*B_pad, 1) int32   t-major flattened tokens (padded batch rows hold token 0)
    emb_ref : (V, E)               embedding table
    wih_ref : (E, 3*GB)            packed x2h weights; gate g lives in lanes [g*GB, g*GB+H)
    bx_ref  : (1, 3*GB)            b_ih (+ b_hr, b_hz folded in), same lane layout
    whh_ref : (H, 3*GB)            packed h2h weights (natural K = H contraction)
    bhn_ref : (1, H)               b_hn (kept separate: n-gate is r * (h@Whn + b_hn))
    wfc_ref : (H, Op)              final Linear weight (lanes padded to 128)
    bfc_ref : (1, Op)              final Linear bias
    out_ref : (B_pad, Op)          sigmoid(fc(h_T))
    gx_ref  : (T*B_pad, 3*GB)      VMEM scratch: pre-projected input gates for every step
    """
    TB = tok_ref.shape[0]
    V = emb_ref.shape[0]
    H = whh_ref.shape[0]
    GB = whh_ref.shape[1] // 3          # per-gate lane block (128-aligned)
    B_pad = out_ref.shape[0]
    T = TB // B_pad

    # ---- prologue (off the serial path): fused embedding gather + x2h projection ----------
    # Per-vocab gate table: table[v] = embedding[v] @ W_ih_packed + b_x          -> (V, 3*GB)
    table = jnp.dot(emb_ref[...], wih_ref[...],
                    preferred_element_type=jnp.float32) + bx_ref[...]
    # One-hot gather on the MXU: row (t*B_pad + b) of gx = table[token[b, t]].
    onehot = jnp.where(
        tok_ref[...] == jax.lax.broadcasted_iota(jnp.int32, (TB, V), 1), 1.0, 0.0)
    gx_ref[...] = jnp.dot(onehot, table, preferred_element_type=jnp.float32)

    whh = whh_ref[...]                                   # (H, 3*GB): 12 vregs, stays resident
    bhn = jnp.broadcast_to(bhn_ref[...], (B_pad, H))     # broadcast hoisted out of the loop

    # ---- GRU recurrence (serial, latency-bound): one packed K=H matmul per step ------------
    h = jnp.zeros((B_pad, H), jnp.float32)
    for t in range(T):       # T is small here; static unroll keeps every slice vreg-aligned
        gx = gx_ref[pl.ds(t * B_pad, B_pad), :]                            # (B_pad, 3*GB)
        gh = jnp.dot(h, whh, preferred_element_type=jnp.float32)           # (B_pad, 3*GB)
        r = jax.nn.sigmoid(gx[:, 0 * GB:0 * GB + H] + gh[:, 0 * GB:0 * GB + H])
        z = jax.nn.sigmoid(gx[:, 1 * GB:1 * GB + H] + gh[:, 1 * GB:1 * GB + H])
        n = jnp.tanh(gx[:, 2 * GB:2 * GB + H] + r * (gh[:, 2 * GB:2 * GB + H] + bhn))
        h = n + z * (h - n)                              # custom GRUCell: hy = n + z * (h - n)

    # ---- head: Linear + Sigmoid -------------------------------------------------------------
    logits = jnp.dot(h, wfc_ref[...], preferred_element_type=jnp.float32) + bfc_ref[...]
    out_ref[...] = jax.nn.sigmoid(logits)


def simple_gru_forward(tokens, params, num_layers):
    """tokens: (B, T) int32.  Returns sigmoid(fc(h_last)) of shape (B, output_size)."""
    if num_layers > 1:
        # Torch code never updates hidden[0] when num_layers > 1; outs[-1] only depends on
        # the final step: outs[-1] = cell0(emb[:, T-1, :], zeros).
        tokens = tokens[:, -1:]

    B, T = tokens.shape
    V, E = params["embedding"].shape
    H = params["w_hh"].shape[-1]
    O = params["w_fc"].shape[-1]

    LANE, SUB = 128, 8
    B_pad = _round_up(B, SUB)
    GB = _round_up(H, LANE)              # per-gate lane block
    Gp = 3 * GB
    Op = _round_up(O, LANE)

    # ---- weight-only packing / padding (the activation path is fully inside the kernel) -----
    def pack_gates(w):                   # (3, in_dim, H) -> (in_dim, 3*GB)
        w_p = jnp.pad(w, ((0, 0), (0, 0), (0, GB - H)))
        return jnp.transpose(w_p, (1, 0, 2)).reshape(w.shape[1], Gp)

    emb_p = params["embedding"].astype(jnp.float32)                       # (V, E)
    wih_p = pack_gates(params["w_ih"]).astype(jnp.float32)                # (E, Gp)
    whh_p = pack_gates(params["w_hh"]).astype(jnp.float32)                # (H, Gp)
    # Fold b_hr / b_hz into the x-side bias; b_hn must stay with the h2h term.
    bx = jnp.stack([params["b_ih"][0] + params["b_hh"][0],
                    params["b_ih"][1] + params["b_hh"][1],
                    params["b_ih"][2]], axis=0)                           # (3, H)
    bx_p = jnp.pad(bx, ((0, 0), (0, GB - H))).reshape(1, Gp)              # (1, Gp)
    bhn_p = params["b_hh"][2].reshape(1, H)                               # (1, H)
    wfc_p = jnp.pad(params["w_fc"], ((0, 0), (0, Op - O)))                # (H, Op)
    bfc_p = jnp.pad(params["b_fc"], ((0, 0), (0, Op - O)))                # (1, Op)

    # ---- tokens: t-major flat layout, row t*B_pad + b (padded batch rows are inert) ---------
    tok_flat = jnp.pad(tokens, ((0, B_pad - B), (0, 0))).astype(jnp.int32)   # (B_pad, T)
    tok_flat = jnp.transpose(tok_flat, (1, 0)).reshape(T * B_pad, 1)         # (T*B_pad, 1)

    cost = pl.CostEstimate(
        flops=int(2 * (V * E * Gp + T * B_pad * V * Gp + T * B_pad * H * Gp + B_pad * H * Op)),
        transcendentals=int(T * B_pad * 3 * H + B_pad * Op),
        bytes_accessed=int(4 * (T * B_pad + V * E + E * Gp + Gp + H * Gp + H + H * Op + Op
                                + B_pad * Op)),
    )

    vmem_spec = pl.BlockSpec(memory_space=pltpu.MemorySpace.VMEM)
    out_padded = pl.pallas_call(
        gru_kernel,
        out_shape=jax.ShapeDtypeStruct((B_pad, Op), jnp.float32),
        in_specs=[vmem_spec] * 8,
        out_specs=vmem_spec,
        scratch_shapes=[pltpu.VMEM((T * B_pad, Gp), jnp.float32)],
        cost_estimate=cost,
    )(tok_flat, emb_p, wih_p, bx_p, whh_p, bhn_p, wfc_p, bfc_p)

    return out_padded[:B, :O]


def reference_forward(tokens, params, num_layers):
    """Pure-JAX replication of the PyTorch forward (for the correctness check)."""
    emb = jnp.take(params["embedding"], tokens, axis=0)   # (B, T, E)
    B, T, _ = emb.shape
    H = params["w_hh"].shape[-1]
    h0 = jnp.zeros((B, H), jnp.float32)

    def cell(x_t, h):
        gx = [x_t @ params["w_ih"][g] + params["b_ih"][g] for g in range(3)]
        gh = [h @ params["w_hh"][g] + params["b_hh"][g] for g in range(3)]
        r = jax.nn.sigmoid(gx[0] + gh[0])
        z = jax.nn.sigmoid(gx[1] + gh[1])
        n = jnp.tanh(gx[2] + r * gh[2])
        return n + z * (h - n)

    hidden0 = h0
    last = None
    for t in range(T):
        hidden_l = cell(emb[:, t, :], hidden0)
        if num_layers == 1:
            hidden0 = hidden_l   # only updated in the single-layer case (matches torch code)
        last = hidden_l
    logits = last @ params["w_fc"] + params["b_fc"][0]
    return jax.nn.sigmoid(logits)


def init_params(key, vocab_size, embedding_size, hidden_size, output_size):
    k = 1.0 / np.sqrt(hidden_size)
    keys = jax.random.split(key, 7)
    return {
        "embedding": jax.random.normal(keys[0], (vocab_size, embedding_size), jnp.float32),
        "w_ih": jax.random.uniform(keys[1], (3, embedding_size, hidden_size), jnp.float32, -k, k),
        "w_hh": jax.random.uniform(keys[2], (3, hidden_size, hidden_size), jnp.float32, -k, k),
        "b_ih": jax.random.uniform(keys[3], (3, hidden_size), jnp.float32, -k, k),
        "b_hh": jax.random.uniform(keys[4], (3, hidden_size), jnp.float32, -k, k),
        "w_fc": jax.random.uniform(keys[5], (hidden_size, output_size), jnp.float32, -k, k),
        "b_fc": jax.random.uniform(keys[6], (1, output_size), jnp.float32, -k, k),
    }


if __name__ == "__main__":
    vocab_size = 16
    embedding_size = 32      # == input_size (embedding feeds the first GRUCell)
    hidden_size = 32
    num_layers = 1
    output_size = 4
    batch = 2
    seq = 8

    key = jax.random.PRNGKey(0)
    pkey, tkey = jax.random.split(key)
    params = init_params(pkey, vocab_size, embedding_size, hidden_size, output_size)
    tokens = jax.random.randint(tkey, (batch, seq), 0, vocab_size, dtype=jnp.int32)

    fwd = jax.jit(simple_gru_forward, static_argnames=("num_layers",))
    out = fwd(tokens, params, num_layers=num_layers)
    out = jax.block_until_ready(out)

    ref = reference_forward(tokens, params, num_layers)
    np.testing.assert_allclose(np.asarray(out), np.asarray(ref), rtol=1e-5, atol=1e-5)

    assert out.shape == (batch, output_size)
    print("KERNEL_OK")
</pallas_src>

<mosaic_0001>
module attributes {stable_mosaic.version = 11 : i64} {
  func.func @gru_kernel(%arg0: memref<64x1xi32, #tpu.memory_space<vmem>>, %arg1: memref<16x32xf32, #tpu.memory_space<vmem>>, %arg2: memref<32x384xf32, #tpu.memory_space<vmem>>, %arg3: memref<1x384xf32, #tpu.memory_space<vmem>>, %arg4: memref<32x384xf32, #tpu.memory_space<vmem>>, %arg5: memref<1x32xf32, #tpu.memory_space<vmem>>, %arg6: memref<32x128xf32, #tpu.memory_space<vmem>>, %arg7: memref<1x128xf32, #tpu.memory_space<vmem>>, %arg8: memref<8x128xf32, #tpu.memory_space<vmem>>, %arg9: memref<64x384xf32, #tpu.memory_space<vmem>>) attributes {dimension_semantics = [], scalar_prefetch = 0 : i64, scratch_operands = 1 : i64, tpu.core_type = #tpu.core_type<tc>} {
    %c0 = arith.constant 0 : index
    %c0_0 = arith.constant 0 : index
    %0 = vector.load %arg1[%c0, %c0_0] : memref<16x32xf32, #tpu.memory_space<vmem>>, vector<16x32xf32>
    %c0_1 = arith.constant 0 : index
    %c0_2 = arith.constant 0 : index
    %1 = vector.load %arg2[%c0_1, %c0_2] : memref<32x384xf32, #tpu.memory_space<vmem>>, vector<32x384xf32>
    %cst = arith.constant dense<0.000000e+00> : vector<16x384xf32>
    %2 = tpu.matmul %0, %1, %cst {dimension_numbers = #tpu.dot_dimension_numbers<[1], [0], [0], [1], [0, 0, 1, 1], [], []>} : vector<16x32xf32>, vector<32x384xf32>, vector<16x384xf32> -> vector<16x384xf32>
    %c0_3 = arith.constant 0 : index
    %c0_4 = arith.constant 0 : index
    %3 = vector.load %arg3[%c0_3, %c0_4] : memref<1x384xf32, #tpu.memory_space<vmem>>, vector<1x384xf32>
    %4 = vector.broadcast %3 : vector<1x384xf32> to vector<16x384xf32>
    %5 = arith.addf %2, %4 : vector<16x384xf32>
    %c0_5 = arith.constant 0 : index
    %c0_6 = arith.constant 0 : index
    %6 = vector.load %arg0[%c0_5, %c0_6] : memref<64x1xi32, #tpu.memory_space<vmem>>, vector<64x1xi32>
    %7 = tpu.iota {dimensions = array<i32: 1>} : vector<64x16xi32>
    %8 = vector.broadcast %6 : vector<64x1xi32> to vector<64x16xi32>
    %9 = arith.cmpi eq, %8, %7 : vector<64x16xi32>
    %cst_7 = arith.constant 1.000000e+00 : f32
    %cst_8 = arith.constant 0.000000e+00 : f32
    %10 = vector.broadcast %cst_7 : f32 to vector<64x16xf32>
    %11 = vector.broadcast %cst_8 : f32 to vector<64x16xf32>
    %12 = arith.select %9, %10, %11 : vector<64x16xi1>, vector<64x16xf32>
    %cst_9 = arith.constant dense<0.000000e+00> : vector<64x384xf32>
    %13 = tpu.matmul %12, %5, %cst_9 {dimension_numbers = #tpu.dot_dimension_numbers<[1], [0], [0], [1], [0, 0, 1, 1], [], []>} : vector<64x16xf32>, vector<16x384xf32>, vector<64x384xf32> -> vector<64x384xf32>
    %c0_10 = arith.constant 0 : index
    %c0_11 = arith.constant 0 : index
    %14 = vector.load %arg9[%c0_10, %c0_11] : memref<64x384xf32, #tpu.memory_space<vmem>>, vector<64x384xf32>
    tpu.vector_store %arg9[%c0_10, %c0_11], %13 {strides = array<i32>} : memref<64x384xf32, #tpu.memory_space<vmem>>, vector<64x384xf32>,
    %c0_12 = arith.constant 0 : index
    %c0_13 = arith.constant 0 : index
    %15 = vector.load %arg4[%c0_12, %c0_13] : memref<32x384xf32, #tpu.memory_space<vmem>>, vector<32x384xf32>
    %c0_14 = arith.constant 0 : index
    %c0_15 = arith.constant 0 : index
    %16 = vector.load %arg5[%c0_14, %c0_15] : memref<1x32xf32, #tpu.memory_space<vmem>>, vector<1x32xf32>
    %17 = vector.shape_cast %16 : vector<1x32xf32> to vector<1x32xf32>
    %18 = vector.broadcast %17 : vector<1x32xf32> to vector<8x32xf32>
    %cst_16 = arith.constant 0.000000e+00 : f32
    %19 = vector.broadcast %cst_16 : f32 to vector<8x32xf32>
    %c0_17 = arith.constant 0 : index
    %c0_18 = arith.constant 0 : index
    %20 = vector.load %arg9[%c0_17, %c0_18] : memref<64x384xf32, #tpu.memory_space<vmem>>, vector<8x384xf32>
    %cst_19 = arith.constant dense<0.000000e+00> : vector<8x384xf32>
    %21 = tpu.matmul %19, %15, %cst_19 {dimension_numbers = #tpu.dot_dimension_numbers<[1], [0], [0], [1], [0, 0, 1, 1], [], []>} : vector<8x32xf32>, vector<32x384xf32>, vector<8x384xf32> -> vector<8x384xf32>
    %22 = vector.extract_strided_slice %20 {offsets = [0, 0], sizes = [8, 32], strides = [1, 1]} : vector<8x384xf32> to vector<8x32xf32>
    %23 = vector.extract_strided_slice %21 {offsets = [0, 0], sizes = [8, 32], strides = [1, 1]} : vector<8x384xf32> to vector<8x32xf32>
    %24 = arith.addf %22, %23 : vector<8x32xf32>
    %25 = arith.negf %24 : vector<8x32xf32>
    %26 = math.exp %25 : vector<8x32xf32>
    %cst_20 = arith.constant 1.000000e+00 : f32
    %27 = vector.broadcast %cst_20 : f32 to vector<8x32xf32>
    %28 = arith.addf %27, %26 : vector<8x32xf32>
    %29 = arith.divf %27, %28 : vector<8x32xf32>
    %30 = vector.extract_strided_slice %20 {offsets = [0, 128], sizes = [8, 32], strides = [1, 1]} : vector<8x384xf32> to vector<8x32xf32>
    %31 = vector.extract_strided_slice %21 {offsets = [0, 128], sizes = [8, 32], strides = [1, 1]} : vector<8x384xf32> to vector<8x32xf32>
    %32 = arith.addf %30, %31 : vector<8x32xf32>
    %33 = arith.negf %32 : vector<8x32xf32>
    %34 = math.exp %33 : vector<8x32xf32>
    %cst_21 = arith.constant 1.000000e+00 : f32
    %35 = vector.broadcast %cst_21 : f32 to vector<8x32xf32>
    %36 = arith.addf %35, %34 : vector<8x32xf32>
    %37 = arith.divf %35, %36 : vector<8x32xf32>
    %38 = vector.extract_strided_slice %20 {offsets = [0, 256], sizes = [8, 32], strides = [1, 1]} : vector<8x384xf32> to vector<8x32xf32>
    %39 = vector.extract_strided_slice %21 {offsets = [0, 256], sizes = [8, 32], strides = [1, 1]} : vector<8x384xf32> to vector<8x32xf32>
    %40 = arith.addf %39, %18 : vector<8x32xf32>
    %41 = arith.mulf %29, %40 : vector<8x32xf32>
    %42 = arith.addf %38, %41 : vector<8x32xf32>
    %43 = math.tanh %42 : vector<8x32xf32>
    %44 = arith.subf %19, %43 : vector<8x32xf32>
    %45 = arith.mulf %37, %44 : vector<8x32xf32>
    %46 = arith.addf %43, %45 : vector<8x32xf32>
    %c8 = arith.constant 8 : index
    %c0_22 = arith.constant 0 : index
    %47 = vector.load %arg9[%c8, %c0_22] : memref<64x384xf32, #tpu.memory_space<vmem>>, vector<8x384xf32>
    %cst_23 = arith.constant dense<0.000000e+00> : vector<8x384xf32>
    %48 = tpu.matmul %46, %15, %cst_23 {dimension_numbers = #tpu.dot_dimension_numbers<[1], [0], [0], [1], [0, 0, 1, 1], [], []>} : vector<8x32xf32>, vector<32x384xf32>, vector<8x384xf32> -> vector<8x384xf32>
    %49 = vector.extract_strided_slice %47 {offsets = [0, 0], sizes = [8, 32], strides = [1, 1]} : vector<8x384xf32> to vector<8x32xf32>
    %50 = vector.extract_strided_slice %48 {offsets = [0, 0], sizes = [8, 32], strides = [1, 1]} : vector<8x384xf32> to vector<8x32xf32>
    %51 = arith.addf %49, %50 : vector<8x32xf32>
    %52 = arith.negf %51 : vector<8x32xf32>
    %53 = math.exp %52 : vector<8x32xf32>
    %cst_24 = arith.constant 1.000000e+00 : f32
    %54 = vector.broadcast %cst_24 : f32 to vector<8x32xf32>
    %55 = arith.addf %54, %53 : vector<8x32xf32>
    %56 = arith.divf %54, %55 : vector<8x32xf32>
    %57 = vector.extract_strided_slice %47 {offsets = [0, 128], sizes = [8, 32], strides = [1, 1]} : vector<8x384xf32> to vector<8x32xf32>
    %58 = vector.extract_strided_slice %48 {offsets = [0, 128], sizes = [8, 32], strides = [1, 1]} : vector<8x384xf32> to vector<8x32xf32>
    %59 = arith.addf %57, %58 : vector<8x32xf32>
    %60 = arith.negf %59 : vector<8x32xf32>
    %61 = math.exp %60 : vector<8x32xf32>
    %cst_25 = arith.constant 1.000000e+00 : f32
    %62 = vector.broadcast %cst_25 : f32 to vector<8x32xf32>
    %63 = arith.addf %62, %61 : vector<8x32xf32>
    %64 = arith.divf %62, %63 : vector<8x32xf32>
    %65 = vector.extract_strided_slice %47 {offsets = [0, 256], sizes = [8, 32], strides = [1, 1]} : vector<8x384xf32> to vector<8x32xf32>
    %66 = vector.extract_strided_slice %48 {offsets = [0, 256], sizes = [8, 32], strides = [1, 1]} : vector<8x384xf32> to vector<8x32xf32>
    %67 = arith.addf %66, %18 : vector<8x32xf32>
    %68 = arith.mulf %56, %67 : vector<8x32xf32>
    %69 = arith.addf %65, %68 : vector<8x32xf32>
    %70 = math.tanh %69 : vector<8x32xf32>
    %71 = arith.subf %46, %70 : vector<8x32xf32>
    %72 = arith.mulf %64, %71 : vector<8x32xf32>
    %73 = arith.addf %70, %72 : vector<8x32xf32>
    %c16 = arith.constant 16 : index
    %c0_26 = arith.constant 0 : index
    %74 = vector.load %arg9[%c16, %c0_26] : memref<64x384xf32, #tpu.memory_space<vmem>>, vector<8x384xf32>
    %cst_27 = arith.constant dense<0.000000e+00> : vector<8x384xf32>
    %75 = tpu.matmul %73, %15, %cst_27 {dimension_numbers = #tpu.dot_dimension_numbers<[1], [0], [0], [1], [0, 0, 1, 1], [], []>} : vector<8x32xf32>, vector<32x384xf32>, vector<8x384xf32> -> vector<8x384xf32>
    %76 = vector.extract_strided_slice %74 {offsets = [0, 0], sizes = [8, 32], strides = [1, 1]} : vector<8x384xf32> to vector<8x32xf32>
    %77 = vector.extract_strided_slice %75 {offsets = [0, 0], sizes = [8, 32], strides = [1, 1]} : vector<8x384xf32> to vector<8x32xf32>
    %78 = arith.addf %76, %77 : vector<8x32xf32>
    %79 = arith.negf %78 : vector<8x32xf32>
    %80 = math.exp %79 : vector<8x32xf32>
    %cst_28 = arith.constant 1.000000e+00 : f32
    %81 = vector.broadcast %cst_28 : f32 to vector<8x32xf32>
    %82 = arith.addf %81, %80 : vector<8x32xf32>
    %83 = arith.divf %81, %82 : vector<8x32xf32>
    %84 = vector.extract_strided_slice %74 {offsets = [0, 128], sizes = [8, 32], strides = [1, 1]} : vector<8x384xf32> to vector<8x32xf32>
    %85 = vector.extract_strided_slice %75 {offsets = [0, 128], sizes = [8, 32], strides = [1, 1]} : vector<8x384xf32> to vector<8x32xf32>
    %86 = arith.addf %84, %85 : vector<8x32xf32>
    %87 = arith.negf %86 : vector<8x32xf32>
    %88 = math.exp %87 : vector<8x32xf32>
    %cst_29 = arith.constant 1.000000e+00 : f32
    %89 = vector.broadcast %cst_29 : f32 to vector<8x32xf32>
    %90 = arith.addf %89, %88 : vector<8x32xf32>
    %91 = arith.divf %89, %90 : vector<8x32xf32>
    %92 = vector.extract_strided_slice %74 {offsets = [0, 256], sizes = [8, 32], strides = [1, 1]} : vector<8x384xf32> to vector<8x32xf32>
    %93 = vector.extract_strided_slice %75 {offsets = [0, 256], sizes = [8, 32], strides = [1, 1]} : vector<8x384xf32> to vector<8x32xf32>
    %94 = arith.addf %93, %18 : vector<8x32xf32>
    %95 = arith.mulf %83, %94 : vector<8x32xf32>
    %96 = arith.addf %92, %95 : vector<8x32xf32>
    %97 = math.tanh %96 : vector<8x32xf32>
    %98 = arith.subf %73, %97 : vector<8x32xf32>
    %99 = arith.mulf %91, %98 : vector<8x32xf32>
    %100 = arith.addf %97, %99 : vector<8x32xf32>
    %c24 = arith.constant 24 : index
    %c0_30 = arith.constant 0 : index
    %101 = vector.load %arg9[%c24, %c0_30] : memref<64x384xf32, #tpu.memory_space<vmem>>, vector<8x384xf32>
    %cst_31 = arith.constant dense<0.000000e+00> : vector<8x384xf32>
    %102 = tpu.matmul %100, %15, %cst_31 {dimension_numbers = #tpu.dot_dimension_numbers<[1], [0], [0], [1], [0, 0, 1, 1], [], []>} : vector<8x32xf32>, vector<32x384xf32>, vector<8x384xf32> -> vector<8x384xf32>
    %103 = vector.extract_strided_slice %101 {offsets = [0, 0], sizes = [8, 32], strides = [1, 1]} : vector<8x384xf32> to vector<8x32xf32>
    %104 = vector.extract_strided_slice %102 {offsets = [0, 0], sizes = [8, 32], strides = [1, 1]} : vector<8x384xf32> to vector<8x32xf32>
    %105 = arith.addf %103, %104 : vector<8x32xf32>
    %106 = arith.negf %105 : vector<8x32xf32>
    %107 = math.exp %106 : vector<8x32xf32>
    %cst_32 = arith.constant 1.000000e+00 : f32
    %108 = vector.broadcast %cst_32 : f32 to vector<8x32xf32>
    %109 = arith.addf %108, %107 : vector<8x32xf32>
    %110 = arith.divf %108, %109 : vector<8x32xf32>
    %111 = vector.extract_strided_slice %101 {offsets = [0, 128], sizes = [8, 32], strides = [1, 1]} : vector<8x384xf32> to vector<8x32xf32>
    %112 = vector.extract_strided_slice %102 {offsets = [0, 128], sizes = [8, 32], strides = [1, 1]} : vector<8x384xf32> to vector<8x32xf32>
    %113 = arith.addf %111, %112 : vector<8x32xf32>
    %114 = arith.negf %113 : vector<8x32xf32>
    %115 = math.exp %114 : vector<8x32xf32>
    %cst_33 = arith.constant 1.000000e+00 : f32
    %116 = vector.broadcast %cst_33 : f32 to vector<8x32xf32>
    %117 = arith.addf %116, %115 : vector<8x32xf32>
    %118 = arith.divf %116, %117 : vector<8x32xf32>
    %119 = vector.extract_strided_slice %101 {offsets = [0, 256], sizes = [8, 32], strides = [1, 1]} : vector<8x384xf32> to vector<8x32xf32>
    %120 = vector.extract_strided_slice %102 {offsets = [0, 256], sizes = [8, 32], strides = [1, 1]} : vector<8x384xf32> to vector<8x32xf32>
    %121 = arith.addf %120, %18 : vector<8x32xf32>
    %122 = arith.mulf %110, %121 : vector<8x32xf32>
    %123 = arith.addf %119, %122 : vector<8x32xf32>
    %124 = math.tanh %123 : vector<8x32xf32>
    %125 = arith.subf %100, %124 : vector<8x32xf32>
    %126 = arith.mulf %118, %125 : vector<8x32xf32>
    %127 = arith.addf %124, %126 : vector<8x32xf32>
    %c32 = arith.constant 32 : index
    %c0_34 = arith.constant 0 : index
    %128 = vector.load %arg9[%c32, %c0_34] : memref<64x384xf32, #tpu.memory_space<vmem>>, vector<8x384xf32>
    %cst_35 = arith.constant dense<0.000000e+00> : vector<8x384xf32>
    %129 = tpu.matmul %127, %15, %cst_35 {dimension_numbers = #tpu.dot_dimension_numbers<[1], [0], [0], [1], [0, 0, 1, 1], [], []>} : vector<8x32xf32>, vector<32x384xf32>, vector<8x384xf32> -> vector<8x384xf32>
    %130 = vector.extract_strided_slice %128 {offsets = [0, 0], sizes = [8, 32], strides = [1, 1]} : vector<8x384xf32> to vector<8x32xf32>
    %131 = vector.extract_strided_slice %129 {offsets = [0, 0], sizes = [8, 32], strides = [1, 1]} : vector<8x384xf32> to vector<8x32xf32>
    %132 = arith.addf %130, %131 : vector<8x32xf32>
    %133 = arith.negf %132 : vector<8x32xf32>
    %134 = math.exp %133 : vector<8x32xf32>
    %cst_36 = arith.constant 1.000000e+00 : f32
    %135 = vector.broadcast %cst_36 : f32 to vector<8x32xf32>
    %136 = arith.addf %135, %134 : vector<8x32xf32>
    %137 = arith.divf %135, %136 : vector<8x32xf32>
    %138 = vector.extract_strided_slice %128 {offsets = [0, 128], sizes = [8, 32], strides = [1, 1]} : vector<8x384xf32> to vector<8x32xf32>
    %139 = vector.extract_strided_slice %129 {offsets = [0, 128], sizes = [8, 32], strides = [1, 1]} : vector<8x384xf32> to vector<8x32xf32>
    %140 = arith.addf %138, %139 : vector<8x32xf32>
    %141 = arith.negf %140 : vector<8x32xf32>
    %142 = math.exp %141 : vector<8x32xf32>
    %cst_37 = arith.constant 1.000000e+00 : f32
    %143 = vector.broadcast %cst_37 : f32 to vector<8x32xf32>
    %144 = arith.addf %143, %142 : vector<8x32xf32>
    %145 = arith.divf %143, %144 : vector<8x32xf32>
    %146 = vector.extract_strided_slice %128 {offsets = [0, 256], sizes = [8, 32], strides = [1, 1]} : vector<8x384xf32> to vector<8x32xf32>
    %147 = vector.extract_strided_slice %129 {offsets = [0, 256], sizes = [8, 32], strides = [1, 1]} : vector<8x384xf32> to vector<8x32xf32>
    %148 = arith.addf %147, %18 : vector<8x32xf32>
    %149 = arith.mulf %137, %148 : vector<8x32xf32>
    %150 = arith.addf %146, %149 : vector<8x32xf32>
    %151 = math.tanh %150 : vector<8x32xf32>
    %152 = arith.subf %127, %151 : vector<8x32xf32>
    %153 = arith.mulf %145, %152 : vector<8x32xf32>
    %154 = arith.addf %151, %153 : vector<8x32xf32>
    %c40 = arith.constant 40 : index
    %c0_38 = arith.constant 0 : index
    %155 = vector.load %arg9[%c40, %c0_38] : memref<64x384xf32, #tpu.memory_space<vmem>>, vector<8x384xf32>
    %cst_39 = arith.constant dense<0.000000e+00> : vector<8x384xf32>
    %156 = tpu.matmul %154, %15, %cst_39 {dimension_numbers = #tpu.dot_dimension_numbers<[1], [0], [0], [1], [0, 0, 1, 1], [], []>} : vector<8x32xf32>, vector<32x384xf32>, vector<8x384xf32> -> vector<8x384xf32>
    %157 = vector.extract_strided_slice %155 {offsets = [0, 0], sizes = [8, 32], strides = [1, 1]} : vector<8x384xf32> to vector<8x32xf32>
    %158 = vector.extract_strided_slice %156 {offsets = [0, 0], sizes = [8, 32], strides = [1, 1]} : vector<8x384xf32> to vector<8x32xf32>
    %159 = arith.addf %157, %158 : vector<8x32xf32>
    %160 = arith.negf %159 : vector<8x32xf32>
    %161 = math.exp %160 : vector<8x32xf32>
    %cst_40 = arith.constant 1.000000e+00 : f32
    %162 = vector.broadcast %cst_40 : f32 to vector<8x32xf32>
    %163 = arith.addf %162, %161 : vector<8x32xf32>
    %164 = arith.divf %162, %163 : vector<8x32xf32>
    %165 = vector.extract_strided_slice %155 {offsets = [0, 128], sizes = [8, 32], strides = [1, 1]} : vector<8x384xf32> to vector<8x32xf32>
    %166 = vector.extract_strided_slice %156 {offsets = [0, 128], sizes = [8, 32], strides = [1, 1]} : vector<8x384xf32> to vector<8x32xf32>
    %167 = arith.addf %165, %166 : vector<8x32xf32>
    %168 = arith.negf %167 : vector<8x32xf32>
    %169 = math.exp %168 : vector<8x32xf32>
    %cst_41 = arith.constant 1.000000e+00 : f32
    %170 = vector.broadcast %cst_41 : f32 to vector<8x32xf32>
    %171 = arith.addf %170, %169 : vector<8x32xf32>
    %172 = arith.divf %170, %171 : vector<8x32xf32>
    %173 = vector.extract_strided_slice %155 {offsets = [0, 256], sizes = [8, 32], strides = [1, 1]} : vector<8x384xf32> to vector<8x32xf32>
    %174 = vector.extract_strided_slice %156 {offsets = [0, 256], sizes = [8, 32], strides = [1, 1]} : vector<8x384xf32> to vector<8x32xf32>
    %175 = arith.addf %174, %18 : vector<8x32xf32>
    %176 = arith.mulf %164, %175 : vector<8x32xf32>
    %177 = arith.addf %173, %176 : vector<8x32xf32>
    %178 = math.tanh %177 : vector<8x32xf32>
    %179 = arith.subf %154, %178 : vector<8x32xf32>
    %180 = arith.mulf %172, %179 : vector<8x32xf32>
    %181 = arith.addf %178, %180 : vector<8x32xf32>
    %c48 = arith.constant 48 : index
    %c0_42 = arith.constant 0 : index
    %182 = vector.load %arg9[%c48, %c0_42] : memref<64x384xf32, #tpu.memory_space<vmem>>, vector<8x384xf32>
    %cst_43 = arith.constant dense<0.000000e+00> : vector<8x384xf32>
    %183 = tpu.matmul %181, %15, %cst_43 {dimension_numbers = #tpu.dot_dimension_numbers<[1], [0], [0], [1], [0, 0, 1, 1], [], []>} : vector<8x32xf32>, vector<32x384xf32>, vector<8x384xf32> -> vector<8x384xf32>
    %184 = vector.extract_strided_slice %182 {offsets = [0, 0], sizes = [8, 32], strides = [1, 1]} : vector<8x384xf32> to vector<8x32xf32>
    %185 = vector.extract_strided_slice %183 {offsets = [0, 0], sizes = [8, 32], strides = [1, 1]} : vector<8x384xf32> to vector<8x32xf32>
    %186 = arith.addf %184, %185 : vector<8x32xf32>
    %187 = arith.negf %186 : vector<8x32xf32>
    %188 = math.exp %187 : vector<8x32xf32>
    %cst_44 = arith.constant 1.000000e+00 : f32
    %189 = vector.broadcast %cst_44 : f32 to vector<8x32xf32>
    %190 = arith.addf %189, %188 : vector<8x32xf32>
    %191 = arith.divf %189, %190 : vector<8x32xf32>
    %192 = vector.extract_strided_slice %182 {offsets = [0, 128], sizes = [8, 32], strides = [1, 1]} : vector<8x384xf32> to vector<8x32xf32>
    %193 = vector.extract_strided_slice %183 {offsets = [0, 128], sizes = [8, 32], strides = [1, 1]} : vector<8x384xf32> to vector<8x32xf32>
    %194 = arith.addf %192, %193 : vector<8x32xf32>
    %195 = arith.negf %194 : vector<8x32xf32>
    %196 = math.exp %195 : vector<8x32xf32>
    %cst_45 = arith.constant 1.000000e+00 : f32
    %197 = vector.broadcast %cst_45 : f32 to vector<8x32xf32>
    %198 = arith.addf %197, %196 : vector<8x32xf32>
    %199 = arith.divf %197, %198 : vector<8x32xf32>
    %200 = vector.extract_strided_slice %182 {offsets = [0, 256], sizes = [8, 32], strides = [1, 1]} : vector<8x384xf32> to vector<8x32xf32>
    %201 = vector.extract_strided_slice %183 {offsets = [0, 256], sizes = [8, 32], strides = [1, 1]} : vector<8x384xf32> to vector<8x32xf32>
    %202 = arith.addf %201, %18 : vector<8x32xf32>
    %203 = arith.mulf %191, %202 : vector<8x32xf32>
    %204 = arith.addf %200, %203 : vector<8x32xf32>
    %205 = math.tanh %204 : vector<8x32xf32>
    %206 = arith.subf %181, %205 : vector<8x32xf32>
    %207 = arith.mulf %199, %206 : vector<8x32xf32>
    %208 = arith.addf %205, %207 : vector<8x32xf32>
    %c56 = arith.constant 56 : index
    %c0_46 = arith.constant 0 : index
    %209 = vector.load %arg9[%c56, %c0_46] : memref<64x384xf32, #tpu.memory_space<vmem>>, vector<8x384xf32>
    %cst_47 = arith.constant dense<0.000000e+00> : vector<8x384xf32>
    %210 = tpu.matmul %208, %15, %cst_47 {dimension_numbers = #tpu.dot_dimension_numbers<[1], [0], [0], [1], [0, 0, 1, 1], [], []>} : vector<8x32xf32>, vector<32x384xf32>, vector<8x384xf32> -> vector<8x384xf32>
    %211 = vector.extract_strided_slice %209 {offsets = [0, 0], sizes = [8, 32], strides = [1, 1]} : vector<8x384xf32> to vector<8x32xf32>
    %212 = vector.extract_strided_slice %210 {offsets = [0, 0], sizes = [8, 32], strides = [1, 1]} : vector<8x384xf32> to vector<8x32xf32>
    %213 = arith.addf %211, %212 : vector<8x32xf32>
    %214 = arith.negf %213 : vector<8x32xf32>
    %215 = math.exp %214 : vector<8x32xf32>
    %cst_48 = arith.constant 1.000000e+00 : f32
    %216 = vector.broadcast %cst_48 : f32 to vector<8x32xf32>
    %217 = arith.addf %216, %215 : vector<8x32xf32>
    %218 = arith.divf %216, %217 : vector<8x32xf32>
    %219 = vector.extract_strided_slice %209 {offsets = [0, 128], sizes = [8, 32], strides = [1, 1]} : vector<8x384xf32> to vector<8x32xf32>
    %220 = vector.extract_strided_slice %210 {offsets = [0, 128], sizes = [8, 32], strides = [1, 1]} : vector<8x384xf32> to vector<8x32xf32>
    %221 = arith.addf %219, %220 : vector<8x32xf32>
    %222 = arith.negf %221 : vector<8x32xf32>
    %223 = math.exp %222 : vector<8x32xf32>
    %cst_49 = arith.constant 1.000000e+00 : f32
    %224 = vector.broadcast %cst_49 : f32 to vector<8x32xf32>
    %225 = arith.addf %224, %223 : vector<8x32xf32>
    %226 = arith.divf %224, %225 : vector<8x32xf32>
    %227 = vector.extract_strided_slice %209 {offsets = [0, 256], sizes = [8, 32], strides = [1, 1]} : vector<8x384xf32> to vector<8x32xf32>
    %228 = vector.extract_strided_slice %210 {offsets = [0, 256], sizes = [8, 32], strides = [1, 1]} : vector<8x384xf32> to vector<8x32xf32>
    %229 = arith.addf %228, %18 : vector<8x32xf32>
    %230 = arith.mulf %218, %229 : vector<8x32xf32>
    %231 = arith.addf %227, %230 : vector<8x32xf32>
    %232 = math.tanh %231 : vector<8x32xf32>
    %233 = arith.subf %208, %232 : vector<8x32xf32>
    %234 = arith.mulf %226, %233 : vector<8x32xf32>
    %235 = arith.addf %232, %234 : vector<8x32xf32>
    %c0_50 = arith.constant 0 : index
    %c0_51 = arith.constant 0 : index
    %236 = vector.load %arg6[%c0_50, %c0_51] : memref<32x128xf32, #tpu.memory_space<vmem>>, vector<32x128xf32>
    %cst_52 = arith.constant dense<0.000000e+00> : vector<8x128xf32>
    %237 = tpu.matmul %235, %236, %cst_52 {dimension_numbers = #tpu.dot_dimension_numbers<[1], [0], [0], [1], [0, 0, 1, 1], [], []>} : vector<8x32xf32>, vector<32x128xf32>, vector<8x128xf32> -> vector<8x128xf32>
    %c0_53 = arith.constant 0 : index
    %c0_54 = arith.constant 0 : index
    %238 = vector.load %arg7[%c0_53, %c0_54] : memref<1x128xf32, #tpu.memory_space<vmem>>, vector<1x128xf32>
    %239 = vector.broadcast %238 : vector<1x128xf32> to vector<8x128xf32>
    %240 = arith.addf %237, %239 : vector<8x128xf32>
    %241 = arith.negf %240 : vector<8x128xf32>
    %242 = math.exp %241 : vector<8x128xf32>
    %cst_55 = arith.constant 1.000000e+00 : f32
    %243 = vector.broadcast %cst_55 : f32 to vector<8x128xf32>
    %244 = arith.addf %243, %242 : vector<8x128xf32>
    %245 = arith.divf %243, %244 : vector<8x128xf32>
    %c0_56 = arith.constant 0 : index
    %c0_57 = arith.constant 0 : index
    %246 = vector.load %arg8[%c0_56, %c0_57] : memref<8x128xf32, #tpu.memory_space<vmem>>, vector<8x128xf32>
    tpu.vector_store %arg8[%c0_56, %c0_57], %245 {strides = array<i32>} : memref<8x128xf32, #tpu.memory_space<vmem>>, vector<8x128xf32>,
    return
  }
}

</mosaic_0001>

<bundles_post_ra>
// kernel: simple_gru_forward.1
= control target key start
LH: loop header
LB: loop body
LE: loop exit
PB: predicated region body
PF: predicated region fallthrough
CT: control target
= control target key end

     0   :  { %v2324_v3 = vmov 0.0   ;;  %v2325_v4 = vmov 0   ;;  %vm60_vm0 = vcmask 261120   ;;  %v45_v24 = vlaneseq  ;;  %s2809_s2 = inlined_call_operand.vmem [shape: f32[32,384], index: 2, kind: input, shape index: {}]   ;;  %s2810_s1 = inlined_call_operand.vmem [shape: f32[16,32], index: 1, kind: input, shape index: {}]   ;;  %s2811_s0 = inlined_call_operand.vmem [shape: s32[64,1], index: 0, kind: input, shape index: {}]   ;;  %s2812_s3 = inlined_call_operand.vmem [shape: f32[1,384], index: 3, kind: input, shape index: {}]   ;;  %s2813_s4 = inlined_call_operand.vmem [shape: f32[32,384], index: 4, kind: input, shape index: {}]   ;;  %s2814_s5 = inlined_call_operand.vmem [shape: f32[1,32], index: 5, kind: input, shape index: {}]   ;;  %s2815_s6 = inlined_call_operand.vmem [shape: f32[32,128], index: 6, kind: input, shape index: {}]   ;;  %s2816_s7 = inlined_call_operand.vmem [shape: f32[1,128], index: 7, kind: input, shape index: {}]   ;;  %s2817_s8 = inlined_call_operand.vmem [shape: f32[8,128], index: 8, kind: output, shape index: {}]  }
   0x1   :  { %v41_v0 = vld [vmem:[%s2809_s2 + $0x50] sm:$0xff]  ;;  %v42_v1 = vld [vmem:[%s2809_s2 + $0x58] sm:$0xff]  ;;  %v40_v2 = vld [vmem:[%s2809_s2 + $0x48] sm:$0xff]  ;;  %131 = vmatprep.mubr.f32.mxu0 %v2324_v3  ;;  %2238 = vset.pattern.permute.xlu0 %v2325_v4  ;;  %vm269_vm1 = vcmask 130048   ;;  %vm2326_vm10 = vmmov 0  }
   0x2   :  { %91 = vmatprep.subr.mxu0 %v41_v0  ;;  %2109 = vmatprep.subr.mxu1 %v42_v1  ;;  %v38_v5 = vld [vmem:[%s2809_s2 + $0x38] sm:$0xff]  ;;  %v39_v6 = vld [vmem:[%s2809_s2 + $0x40] sm:$0xff]  ;;  %v37_v7 = vld [vmem:[%s2809_s2 + $0x30] sm:$0xff]  ;;  %v2445_v25 = vand.u32 127, %v45_v24  ;;  %v46_v28 = vshrl.u32 %v45_v24, 7 }
   0x3   :  { %92 = vmatpush1.msra.mxu0 %v40_v2  ;;  %2110 = vmatpush3.msra.mxu1 %v42_v1  ;;  %v35_v8 = vld [vmem:[%s2809_s2 + $0x20] sm:$0xff]  ;;  %v36_v9 = vld [vmem:[%s2809_s2 + $0x28] sm:$0xff]  ;;  %v34_v10 = vld [vmem:[%s2809_s2 + $0x18] sm:$0xff] }
   0x4   :  { %93 = vmatprep.subr.mxu0 %v38_v5  ;;  %2111 = vmatprep.subr.mxu1 %v39_v6  ;;  %v32_v11 = vld [vmem:[%s2809_s2 + $0x8] sm:$0xff]  ;;  %v33_v12 = vld [vmem:[%s2809_s2 + $0x10] sm:$0xff]  ;;  %v31_v13 = vld [vmem:[%s2809_s2] sm:$0xff]  ;;  %v55_v29 = vsub.s32 2, %v46_v28  ;;  %v47_v33 = vsub.s32 0, %v46_v28  ;;  %v51_v35 = vsub.s32 1, %v46_v28 }
   0x5   :  { %94 = vmatpush1.msra.mxu0 %v37_v7  ;;  %2112 = vmatpush3.msra.mxu1 %v39_v6  ;;  %v29_v14 = vld [vmem:[%s2810_s1] sm:$0xff]  ;;  %v30_v15 = vld [vmem:[%s2810_s1 + $0x8] sm:$0xff]  ;;  %v221_v17 = vld [vmem:[%s2811_s0 + $0x10] sm:$0xff] }
   0x6   :  { %95 = vmatprep.subr.mxu0 %v35_v8  ;;  %2113 = vmatprep.subr.mxu1 %v36_v9  ;;  %v219_v16 = vld [vmem:[%s2811_s0] sm:$0xff]  ;;  %v220_v18 = vld [vmem:[%s2811_s0 + $0x8] sm:$0xff]  ;;  %v222_v19 = vld [vmem:[%s2811_s0 + $0x18] sm:$0xff] }
   0x7   :  { %96 = vmatpush1.msra.mxu0 %v34_v10  ;;  %2114 = vmatpush3.msra.mxu1 %v36_v9  ;;  %v223_v20 = vld [vmem:[%s2811_s0 + $0x20] sm:$0xff]  ;;  %v224_v21 = vld [vmem:[%s2811_s0 + $0x28] sm:$0xff]  ;;  %v225_v22 = vld [vmem:[%s2811_s0 + $0x30] sm:$0xff] }
   0x8   :  { %97 = vmatprep.subr.mxu0 %v32_v11  ;;  %2115 = vmatprep.subr.mxu1 %v33_v12  ;;  %v226_v23 = vld [vmem:[%s2811_s0 + $0x38] sm:$0xff]  ;;  %v43_v31 = vld [vmem:[%s2812_s3] sm:$0x7]  ;;  %v2458_v47 = vld [vmem:[%s2813_s4 + $0x50] sm:$0xff] }
   0x9   :  { %98 = vmatpush1.msra.mxu0 %v31_v13  ;;  %2116 = vmatpush3.msra.mxu1 %v33_v12  ;;  %v56_v34 = vrot.slane %v43_v31, %v55_v29  ;;  %v48_v39 = vrot.slane %v43_v31, %v47_v33  ;;  %v52_v42 = vrot.slane %v43_v31, %v51_v35  ;;  %v2465_v55 = vld [vmem:[%s2813_s4 + $0x48] sm:$0xff]  ;;  %v2473_v57 = vld [vmem:[%s2813_s4 + $0x38] sm:$0xff]  ;;  %v2483_v60 = vld [vmem:[%s2813_s4 + $0x30] sm:$0xff] }
   0xa   :  { %2117 = vmatprep.mubr.msk.f32.mxu1 %vm60_vm0, %v29_v14  ;;  %1994 = vmatmul.mubr.msk.f32.vlgmr.msra.gmra.mxu0 %vm60_vm0, %v29_v14  ;;  %v2491_v62 = vld [vmem:[%s2813_s4 + $0x20] sm:$0xff]  ;;  %v2503_v1 = vld [vmem:[%s2813_s4 + $0x18] sm:$0xff]  ;;  %v2554_v9 = vld [vmem:[%s2813_s4 + $0x28] sm:$0xff] }
   0xb   :  { %2118 = vmatmul.mubr.msk.f32.vlgmr.msra.gmra.mxu1 %vm60_vm0, %v30_v15  ;;  %137 = vmatprep.mubr.f32.mxu0 %v2324_v3  ;;  %v2522_v5 = vld [vmem:[%s2813_s4] sm:$0xff]  ;;  %v2536_v7 = vld [vmem:[%s2813_s4 + $0x58] sm:$0xff]  ;;  %v2563_v10 = vld [vmem:[%s2813_s4 + $0x10] sm:$0xff] }
   0xc   :  { %230 = vperm.xlu0 %2238, %v219_v16   ;;  %2239 = vset.pattern.permute.xlu1 %v2325_v4  ;;  %v2512_v4 = vld [vmem:[%s2813_s4 + $0x8] sm:$0xff]  ;;  %v2544_v8 = vld [vmem:[%s2813_s4 + $0x40] sm:$0xff] }
   0xd   :  { %236 = vperm.xlu1 %2239, %v221_v17   ;;  %358 = vmatprep.mubr.f32.mxu1 %v2324_v3  ;;  %v2608_v31 = vld [vmem:[%s2814_s5] ss:$0 sm:$0xff] }
   0xe   :  { %1995 = vmatmul.mubr.msk.f32.gmra.mxu0 %vm60_vm0, %v30_v15 }
  0x10   :  { %233 = vperm.xlu0 %2238, %v220_v18  }
  0x11   :  { %239 = vperm.xlu1 %2239, %v222_v19  }
  0x14   :  { %242 = vperm.xlu0 %2238, %v223_v20  }
  0x15   :  { %245 = vperm.xlu1 %2239, %v224_v21  }
  0x18   :  { %248 = vperm.xlu0 %2238, %v225_v22  }
  0x19   :  { %251 = vperm.xlu1 %2239, %v226_v23  }
  0x87   :  { %v231_v26 = vpop.permute.xlu0 %230 }
  0x88   :  { %vm253_vm2 = vcmp.eq.s32.totalorder %v231_v26, %v2445_v25  ;;  %v237_v30 = vpop.permute.xlu1 %236 }
  0x89   :  { %v261_v27 = vsel %vm253_vm2, 1.0, %v2324_v3  ;;  %vm255_vm3 = vcmp.eq.s32.totalorder %v237_v30, %v2445_v25 }
  0x8a   :  { %2124 = vmatprep.mubr.msk.f32.mxu0 %vm269_vm1, %v261_v27  ;;  %v263_v48 = vsel %vm255_vm3, 1.0, %v2324_v3 }
  0x8b   :  { %v234_v32 = vpop.permute.xlu0 %233 }
  0x8c   :  { %v240_v38 = vpop.permute.xlu1 %239  ;;  %vm254_vm4 = vcmp.eq.s32.totalorder %v234_v32, %v2445_v25 }
  0x8d   :  { %v262_v51 = vsel %vm254_vm4, 1.0, %v2324_v3  ;;  %vm256_vm5 = vcmp.eq.s32.totalorder %v240_v38, %v2445_v25 }
  0x8e   :  { %v264_v59 = vsel %vm256_vm5, 1.0, %v2324_v3 }
  0x8f   :  { %v243_v44 = vpop.permute.xlu0 %242 }
  0x90   :  { %v246_v53 = vpop.permute.xlu1 %245  ;;  %vm257_vm6 = vcmp.eq.s32.totalorder %v243_v44, %v2445_v25 }
  0x91   :  { %v265_v61 = vsel %vm257_vm6, 1.0, %v2324_v3  ;;  %vm258_vm7 = vcmp.eq.s32.totalorder %v246_v53, %v2445_v25 }
  0x92   :  { %v266_v0 = vsel %vm258_vm7, 1.0, %v2324_v3 }
  0x93   :  { %v249_v58 = vpop.permute.xlu0 %248 }
  0x94   :  { %vm259_vm8 = vcmp.eq.s32.totalorder %v249_v58, %v2445_v25  ;;  %v252_v63 = vpop.permute.xlu1 %251 }
  0x95   :  { %v267_v2 = vsel %vm259_vm8, 1.0, %v2324_v3  ;;  %vm260_vm9 = vcmp.eq.s32.totalorder %v252_v63, %v2445_v25 }
  0x96   :  { %v268_v6 = vsel %vm260_vm9, 1.0, %v2324_v3 }
  0xca   :  { %v133_v36 = vpop.f32.mrf.mxu0 }
  0xcb   :  { %v2119_v37 = vpop.f32.mrf.mxu1  ;;  %v134_v56 = vadd.f32 %v133_v36, %v48_v39 }
  0xcc   :  { %v216_v40 = vadd.f32 %v2119_v37, %v56_v34  ;;  %v135_v41 = vpop.f32.mrf.mxu0 }
  0xcd   :  { %v210_v43 = vpop.f32.mrf.mxu1  ;;  %v136_v52 = vadd.f32 %v135_v41, %v52_v42 }
  0xce   :  { %v211_v45 = vadd.f32 %v210_v43, %v56_v34  ;;  %2120 = vmatprep.subr.mxu0 %v216_v40  ;;  %v139_v46 = vpop.f32.mrf.mxu0 }
  0xcf   :  { %2121 = vmatpush3.msra.mxu0 %v216_v40  ;;  %v140_v49 = vadd.f32 %v139_v46, %v48_v39 }
  0xd0   :  { %2122 = vmatprep.subr.mxu0 %v211_v45  ;;  %v141_v50 = vpop.f32.mrf.mxu0 }
  0xd1   :  { %v142_v54 = vadd.f32 %v141_v50, %v52_v42  ;;  %2123 = vmatpush3.msra.mxu0 %v211_v45 }
  0xd2   :  { %2125 = vmatmul.mubr.msk.f32.vlgmr.msra.gmra.mxu0 %vm269_vm1, %v262_v51  ;;  %585 = vmatprep.subr.mxu0 %v2458_v47 }
  0xd3   :  { %322 = vmatprep.subr.mxu1 %v142_v54  ;;  %2127 = vmatprep.mubr.msk.f32.mxu0 %vm269_vm1, %v263_v48 }
  0xd4   :  { %323 = vmatpush1.msra.mxu1 %v140_v49  ;;  %586 = vmatpush1.msra.mxu0 %v2465_v55 }
  0xd5   :  { %324 = vmatprep.subr.mxu1 %v136_v52  ;;  %587 = vmatprep.subr.mxu0 %v2473_v57 }
  0xd6   :  { %2128 = vmatmul.mubr.msk.f32.gmra.mxu0 %vm269_vm1, %v264_v59  ;;  %325 = vmatpush1.msra.mxu1 %v134_v56 }
  0xd7   :  { %2130 = vmatprep.mubr.msk.f32.mxu0 %vm269_vm1, %v265_v61  ;;  %1998 = vmatmul.mubr.msk.f32.vlgmr.msra.gmra.mxu1 %vm269_vm1, %v261_v27 }
  0xd8   :  { %364 = vmatprep.mubr.f32.mxu1 %v2324_v3  ;;  %588 = vmatpush1.msra.mxu0 %v2483_v60 }
  0xd9   :  { %589 = vmatprep.subr.mxu0 %v2491_v62  ;;  %753 = vmatprep.subr.mxu1 %v2458_v47 }
  0xda   :  { %2131 = vmatmul.mubr.msk.f32.gmra.mxu0 %vm269_vm1, %v266_v0  ;;  %754 = vmatpush1.msra.mxu1 %v2465_v55 }
  0xdb   :  { %2133 = vmatprep.mubr.msk.f32.mxu0 %vm269_vm1, %v267_v2  ;;  %1999 = vmatmul.mubr.msk.f32.gmra.mxu1 %vm269_vm1, %v262_v51 }
  0xdc   :  { %370 = vmatprep.mubr.f32.mxu1 %v2324_v3  ;;  %590 = vmatpush1.msra.mxu0 %v2503_v1 }
  0xdd   :  { %591 = vmatprep.subr.mxu0 %v2512_v4  ;;  %755 = vmatprep.subr.mxu1 %v2473_v57 }
  0xde   :  { %2134 = vmatmul.mubr.msk.f32.gmra.mxu0 %vm269_vm1, %v268_v6  ;;  %756 = vmatpush1.msra.mxu1 %v2483_v60 }
  0xdf   :  { %2000 = vmatmul.mubr.msk.f32.gmra.mxu1 %vm269_vm1, %v263_v48  ;;  %592 = vmatpush1.msra.mxu0 %v2522_v5 }
  0xe0   :  { %625 = vmatprep.mubr.f32.mxu0 %v2324_v3  ;;  %376 = vmatprep.mubr.f32.mxu1 %v2324_v3 }
  0xe1   :  { %2136 = vmatprep.subr.mxu0 %v2324_v3  ;;  %757 = vmatprep.subr.mxu1 %v2491_v62 }
  0xe2   :  { %626 = vmatmul.mubr.f32.vlgmr.msra.gmra.mxu0 %v2324_v3  ;;  %758 = vmatpush1.msra.mxu1 %v2503_v1 }
  0xe3   :  { %2001 = vmatmul.mubr.msk.f32.gmra.mxu1 %vm269_vm1, %v264_v59  ;;  %2137 = vmatpush3.msra.mxu0 %v2536_v7 }
  0xe4   :  { %382 = vmatprep.mubr.f32.mxu1 %v2324_v3  ;;  %2138 = vmatprep.subr.mxu0 %v2324_v3 }
  0xe5   :  { %2139 = vmatpush3.msra.mxu0 %v2544_v8  ;;  %2144 = vmatprep.mubr.msk.f32.mxu0 %vm2326_vm10, %v2324_v3 }
  0xe6   :  { %2140 = vmatprep.subr.mxu0 %v2324_v3  ;;  %759 = vmatprep.subr.mxu1 %v2512_v4 }
  0xe7   :  { %2002 = vmatmul.mubr.msk.f32.gmra.mxu1 %vm269_vm1, %v265_v61  ;;  %2141 = vmatpush3.msra.mxu0 %v2554_v9 }
  0xe8   :  { %388 = vmatprep.mubr.f32.mxu1 %v2324_v3  ;;  %2142 = vmatprep.subr.mxu0 %v2324_v3 }
  0xe9   :  { %2143 = vmatpush3.msra.mxu0 %v2563_v10  ;;  %760 = vmatpush1.msra.mxu1 %v2522_v5 }
  0xea   :  { %2145 = vmatmul.mubr.f32.vlgmr.msra.gmra.mxu0 %v2324_v3  ;;  %2147 = vmatprep.subr.mxu0 %v2324_v3 }
  0xeb   :  { %2003 = vmatmul.mubr.msk.f32.gmra.mxu1 %vm269_vm1, %v266_v0  ;;  %2148 = vmatpush3.msra.mxu0 %v2536_v7 }
  0xec   :  { %394 = vmatprep.mubr.f32.mxu1 %v2324_v3  ;;  %2149 = vmatprep.subr.mxu0 %v2324_v3 }
  0xed   :  { %2150 = vmatpush3.msra.mxu0 %v2544_v8  ;;  %2155 = vmatprep.mubr.msk.f32.mxu0 %vm2326_vm10, %v2324_v3 }
  0xee   :  { %2151 = vmatprep.subr.mxu0 %v2324_v3  ;;  %921 = vmatprep.subr.mxu1 %v2458_v47 }
  0xef   :  { %2004 = vmatmul.mubr.msk.f32.gmra.mxu1 %vm269_vm1, %v267_v2  ;;  %2152 = vmatpush3.msra.mxu0 %v2554_v9 }
  0xf0   :  { %400 = vmatprep.mubr.f32.mxu1 %v2324_v3  ;;  %2153 = vmatprep.subr.mxu0 %v2324_v3 }
  0xf1   :  { %2154 = vmatpush3.msra.mxu0 %v2563_v10 }
  0xf2   :  { %2158 = vmatprep.subr.mxu0 %v2324_v3 }
  0xf3   :  { %2005 = vmatmul.mubr.msk.f32.gmra.mxu1 %vm269_vm1, %v268_v6 }
  0xf4   :  { %793 = vmatprep.mubr.f32.mxu1 %v2324_v3 }
 0x192   :  { %v2591_v11 = vpop.f32.mrf.mxu0 }
 0x194   :  { %v473_v12 = vpop.f32.mrf.mxu0 }
 0x196   :  { %v2593_v13 = vpop.f32.mrf.mxu0 }
 0x197   :  { %v360_v19 = vpop.f32.mrf.mxu1 }
 0x198   :  { %v2595_v14 = vpop.f32.mrf.mxu0 }
 0x199   :  { %v362_v26 = vpop.f32.mrf.mxu1 }
 0x19a   :  { %v2597_v15 = vpop.f32.mrf.mxu0 }
 0x19b   :  { %v366_v43 = vpop.f32.mrf.mxu1 }
 0x19c   :  { %v2599_v16 = vpop.f32.mrf.mxu0 }
 0x19d   :  { %v368_v44 = vpop.f32.mrf.mxu1 }
 0x19e   :  { %v2601_v17 = vpop.f32.mrf.mxu0 }
 0x19f   :  { %v372_v45 = vpop.f32.mrf.mxu1 }
 0x1a0   :  { %v2603_v18 = vpop.f32.mrf.mxu0 }
 0x1a1   :  { %v2632_v46 = vpop.f32.mrf.mxu1 }
 0x1a2   :  { %v627_v20 = vpop.f32.mrf.mxu0 }
 0x1a3   :  { %v702_v21 = vadd.f32 %v627_v20, %v360_v19  ;;  %v2634_v48 = vpop.f32.mrf.mxu1 }
 0x1a4   :  { %v629_v23 = vpop.f32.mrf.mxu0 }
 0x1a5   :  { %v2015_v22 = vmul.f32 -1.442695, %v702_v21  ;;  %v709_v27 = vadd.f32 %v629_v23, %v362_v26  ;;  %v2636_v49 = vpop.f32.mrf.mxu1 }
 0x1a7   :  { %2240 = vpow2.f32 %v2015_v22  ;;  %v2016_v28 = vmul.f32 -1.442695, %v709_v27  ;;  %v2638_v50 = vpop.f32.mrf.mxu1 }
 0x1a9   :  { %2242 = vpow2.f32 %v2016_v28  ;;  %v2640_v51 = vpop.f32.mrf.mxu1 }
 0x1aa   :  { %v698_v24 = vpop.f32.mrf.mxu0 }
 0x1ab   :  { %v716_v32 = vadd.f32 %v2608_v31, %v698_v24  ;;  %v2642_v52 = vpop.f32.mrf.mxu1 }
 0x1ac   :  { %v2146_v25 = vpop.f32.mrf.mxu0 }
 0x1ad   :  { %v2644_v53 = vpop.f32.mrf.mxu1 }
 0x1af   :  { %v2646_v54 = vpop.f32.mrf.mxu1 }
 0x1b1   :  { %v2648_v56 = vpop.f32.mrf.mxu1 }
 0x1b3   :  { %v2650_v58 = vpop.f32.mrf.mxu1 }
 0x1b4   :  { %v2241_v29 = vpop.eup %2240 }
 0x1b5   :  { %v706_v30 = vadd.f32 1.0, %v2241_v29  ;;  %v2652_v59 = vpop.f32.mrf.mxu1 }
 0x1b6   :  { %v2243_v33 = vpop.eup %2242 }
 0x1b7   :  { %2244 = vrcp.f32 %v706_v30  ;;  %v713_v36 = vadd.f32 1.0, %v2243_v33 }
 0x1c4   :  { %v2245_v34 = vpop.eup %2244 }
 0x1c5   :  { %v717_v35 = vmul.f32 %v2245_v34, %v716_v32 }
 0x1c7   :  { %v718_v37 = vadd.f32 %v717_v35, %v473_v12 }
 0x1c9   :  { %2246 = vtanh.f32 %v718_v37 }
 0x1ca   :  { %2248 = vrcp.f32 %v713_v36 }
 0x1d6   :  { %v2247_v38 = vpop.eup %2246 }
 0x1d7   :  { %v720_v39 = vsub.f32 0.0, %v2247_v38  ;;  %v2249_v40 = vpop.eup %2248 }
 0x1d9   :  { %v721_v41 = vmul.f32 %v2249_v40, %v720_v39 }
 0x1db   :  { %v722_v42 = vadd.f32 %v2247_v38, %v721_v41 }
 0x1dd   :  { %2017 = vmatmul.mubr.msk.f32.vlgmr.msra.gmra.mxu1 %vm60_vm0, %v722_v42  ;;  %2156 = vmatmul.mubr.msk.f32.vlgmr.msra.gmra.mxu0 %vm60_vm0, %v722_v42 }
 0x1de   :  { %922 = vmatpush1.msra.mxu1 %v2465_v55  ;;  %2159 = vmatpush3.msra.mxu0 %v2536_v7 }
 0x1df   :  { %923 = vmatprep.subr.mxu1 %v2473_v57  ;;  %2160 = vmatprep.subr.mxu0 %v2324_v3 }
 0x1e0   :  { %924 = vmatpush1.msra.mxu1 %v2483_v60  ;;  %2161 = vmatpush3.msra.mxu0 %v2544_v8 }
 0x1e1   :  { %925 = vmatprep.subr.mxu1 %v2491_v62  ;;  %2162 = vmatprep.subr.mxu0 %v2324_v3 }
 0x1e2   :  { %926 = vmatpush1.msra.mxu1 %v2503_v1  ;;  %2163 = vmatpush3.msra.mxu0 %v2554_v9 }
 0x1e3   :  { %927 = vmatprep.subr.mxu1 %v2512_v4  ;;  %2164 = vmatprep.subr.mxu0 %v2324_v3 }
 0x1e4   :  { %928 = vmatpush1.msra.mxu1 %v2522_v5  ;;  %961 = vmatprep.mubr.f32.mxu1 %v2324_v3 }
 0x1e5   :  { %2165 = vmatpush3.msra.mxu0 %v2563_v10  ;;  %2166 = vmatprep.mubr.msk.f32.mxu0 %vm2326_vm10, %v2324_v3 }
 0x1e6   :  { %1089 = vmatprep.subr.mxu1 %v2458_v47  ;;  %2169 = vmatprep.subr.mxu0 %v2324_v3 }
 0x29d   :  { %v795_v61 = vpop.f32.mrf.mxu1  ;;  %v866_v63 = vpop.f32.mrf.mxu0 }
 0x29e   :  { %v870_v0 = vadd.f32 %v795_v61, %v366_v43  ;;  %v884_v24 = vadd.f32 %v2608_v31, %v866_v63 }
 0x29f   :  { %v2157_v2 = vpop.f32.mrf.mxu0  ;;  %v797_v12 = vpop.f32.mrf.mxu1 }
 0x2a0   :  { %v2019_v6 = vmul.f32 -1.442695, %v870_v0  ;;  %v877_v19 = vadd.f32 %v797_v12, %v368_v44 }
 0x2a2   :  { %2250 = vpow2.f32 %v2019_v6  ;;  %v2020_v20 = vmul.f32 -1.442695, %v877_v19 }
 0x2a4   :  { %2252 = vpow2.f32 %v2020_v20 }
 0x2af   :  { %v2251_v21 = vpop.eup %2250 }
 0x2b0   :  { %v874_v22 = vadd.f32 1.0, %v2251_v21 }
 0x2b1   :  { %v2253_v23 = vpop.eup %2252 }
 0x2b2   :  { %2254 = vrcp.f32 %v874_v22  ;;  %v881_v28 = vadd.f32 1.0, %v2253_v23 }
 0x2bf   :  { %v2255_v25 = vpop.eup %2254 }
 0x2c0   :  { %v885_v26 = vmul.f32 %v2255_v25, %v884_v24 }
 0x2c2   :  { %v886_v27 = vadd.f32 %v2591_v11, %v885_v26 }
 0x2c4   :  { %2256 = vtanh.f32 %v886_v27 }
 0x2c5   :  { %2258 = vrcp.f32 %v881_v28 }
 0x2d1   :  { %v2257_v29 = vpop.eup %2256 }
 0x2d2   :  { %v888_v30 = vsub.f32 %v722_v42, %v2257_v29  ;;  %v2259_v32 = vpop.eup %2258 }
 0x2d4   :  { %v889_v33 = vmul.f32 %v2259_v32, %v888_v30 }
 0x2d6   :  { %v890_v34 = vadd.f32 %v2257_v29, %v889_v33 }
 0x2d8   :  { %2021 = vmatmul.mubr.msk.f32.vlgmr.msra.gmra.mxu1 %vm60_vm0, %v890_v34  ;;  %2167 = vmatmul.mubr.msk.f32.vlgmr.msra.gmra.mxu0 %vm60_vm0, %v890_v34 }
 0x2d9   :  { %1090 = vmatpush1.msra.mxu1 %v2465_v55  ;;  %2170 = vmatpush3.msra.mxu0 %v2536_v7 }
 0x2da   :  { %1091 = vmatprep.subr.mxu1 %v2473_v57  ;;  %2171 = vmatprep.subr.mxu0 %v2324_v3 }
 0x2db   :  { %1092 = vmatpush1.msra.mxu1 %v2483_v60  ;;  %2172 = vmatpush3.msra.mxu0 %v2544_v8 }
 0x2dc   :  { %1093 = vmatprep.subr.mxu1 %v2491_v62  ;;  %2173 = vmatprep.subr.mxu0 %v2324_v3 }
 0x2dd   :  { %1094 = vmatpush1.msra.mxu1 %v2503_v1  ;;  %2174 = vmatpush3.msra.mxu0 %v2554_v9 }
 0x2de   :  { %1095 = vmatprep.subr.mxu1 %v2512_v4  ;;  %2175 = vmatprep.subr.mxu0 %v2324_v3 }
 0x2df   :  { %1096 = vmatpush1.msra.mxu1 %v2522_v5  ;;  %1129 = vmatprep.mubr.f32.mxu1 %v2324_v3 }
 0x2e0   :  { %2176 = vmatpush3.msra.mxu0 %v2563_v10  ;;  %2177 = vmatprep.mubr.msk.f32.mxu0 %vm2326_vm10, %v2324_v3 }
 0x2e1   :  { %1257 = vmatprep.subr.mxu1 %v2458_v47  ;;  %2180 = vmatprep.subr.mxu0 %v2324_v3 }
 0x398   :  { %v963_v11 = vpop.f32.mrf.mxu1  ;;  %v1034_v35 = vpop.f32.mrf.mxu0 }
 0x399   :  { %v1038_v36 = vadd.f32 %v963_v11, %v372_v45  ;;  %v1052_v61 = vadd.f32 %v2608_v31, %v1034_v35 }
 0x39a   :  { %v2168_v37 = vpop.f32.mrf.mxu0  ;;  %v965_v39 = vpop.f32.mrf.mxu1 }
 0x39b   :  { %v2023_v38 = vmul.f32 -1.442695, %v1038_v36  ;;  %v1045_v40 = vadd.f32 %v965_v39, %v2632_v46 }
 0x39d   :  { %2260 = vpow2.f32 %v2023_v38  ;;  %v2024_v41 = vmul.f32 -1.442695, %v1045_v40 }
 0x39f   :  { %2262 = vpow2.f32 %v2024_v41 }
 0x3aa   :  { %v2261_v42 = vpop.eup %2260 }
 0x3ab   :  { %v1042_v43 = vadd.f32 1.0, %v2261_v42 }
 0x3ac   :  { %v2263_v44 = vpop.eup %2262 }
 0x3ad   :  { %2264 = vrcp.f32 %v1042_v43  ;;  %v1049_v6 = vadd.f32 1.0, %v2263_v44 }
 0x3ba   :  { %v2265_v63 = vpop.eup %2264 }
 0x3bb   :  { %v1053_v0 = vmul.f32 %v2265_v63, %v1052_v61 }
 0x3bd   :  { %v1054_v2 = vadd.f32 %v1053_v0, %v2595_v14 }
 0x3bf   :  { %2266 = vtanh.f32 %v1054_v2 }
 0x3c0   :  { %2268 = vrcp.f32 %v1049_v6 }
 0x3cc   :  { %v2267_v45 = vpop.eup %2266 }
 0x3cd   :  { %v1056_v12 = vsub.f32 %v890_v34, %v2267_v45  ;;  %v2269_v19 = vpop.eup %2268 }
 0x3cf   :  { %v1057_v20 = vmul.f32 %v2269_v19, %v1056_v12 }
 0x3d1   :  { %v1058_v46 = vadd.f32 %v2267_v45, %v1057_v20 }
 0x3d3   :  { %2025 = vmatmul.mubr.msk.f32.vlgmr.msra.gmra.mxu1 %vm60_vm0, %v1058_v46  ;;  %2178 = vmatmul.mubr.msk.f32.vlgmr.msra.gmra.mxu0 %vm60_vm0, %v1058_v46 }
 0x3d4   :  { %1258 = vmatpush1.msra.mxu1 %v2465_v55  ;;  %2181 = vmatpush3.msra.mxu0 %v2536_v7 }
 0x3d5   :  { %1259 = vmatprep.subr.mxu1 %v2473_v57  ;;  %2182 = vmatprep.subr.mxu0 %v2324_v3 }
 0x3d6   :  { %1260 = vmatpush1.msra.mxu1 %v2483_v60  ;;  %2183 = vmatpush3.msra.mxu0 %v2544_v8 }
 0x3d7   :  { %1261 = vmatprep.subr.mxu1 %v2491_v62  ;;  %2184 = vmatprep.subr.mxu0 %v2324_v3 }
 0x3d8   :  { %1262 = vmatpush1.msra.mxu1 %v2503_v1  ;;  %2185 = vmatpush3.msra.mxu0 %v2554_v9 }
 0x3d9   :  { %1263 = vmatprep.subr.mxu1 %v2512_v4  ;;  %2186 = vmatprep.subr.mxu0 %v2324_v3 }
 0x3da   :  { %1264 = vmatpush1.msra.mxu1 %v2522_v5  ;;  %1297 = vmatprep.mubr.f32.mxu1 %v2324_v3 }
 0x3db   :  { %2187 = vmatpush3.msra.mxu0 %v2563_v10  ;;  %2188 = vmatprep.mubr.msk.f32.mxu0 %vm2326_vm10, %v2324_v3 }
 0x3dc   :  { %1425 = vmatprep.subr.mxu1 %v2458_v47  ;;  %2191 = vmatprep.subr.mxu0 %v2324_v3 }
 0x493   :  { %v1131_v14 = vpop.f32.mrf.mxu1  ;;  %v1202_v21 = vpop.f32.mrf.mxu0 }
 0x494   :  { %v1206_v22 = vadd.f32 %v1131_v14, %v2634_v48  ;;  %v1220_v32 = vadd.f32 %v2608_v31, %v1202_v21 }
 0x495   :  { %v2179_v23 = vpop.f32.mrf.mxu0  ;;  %v1133_v25 = vpop.f32.mrf.mxu1 }
 0x496   :  { %v2027_v24 = vmul.f32 -1.442695, %v1206_v22  ;;  %v1213_v26 = vadd.f32 %v1133_v25, %v2636_v49 }
 0x498   :  { %2270 = vpow2.f32 %v2027_v24  ;;  %v2028_v27 = vmul.f32 -1.442695, %v1213_v26 }
 0x49a   :  { %2272 = vpow2.f32 %v2028_v27 }
 0x4a5   :  { %v2271_v28 = vpop.eup %2270 }
 0x4a6   :  { %v1210_v29 = vadd.f32 1.0, %v2271_v28 }
 0x4a7   :  { %v2273_v30 = vpop.eup %2272 }
 0x4a8   :  { %2274 = vrcp.f32 %v1210_v29  ;;  %v1217_v35 = vadd.f32 1.0, %v2273_v30 }
 0x4b5   :  { %v2275_v33 = vpop.eup %2274 }
 0x4b6   :  { %v1221_v34 = vmul.f32 %v2275_v33, %v1220_v32 }
 0x4b8   :  { %v1222_v11 = vadd.f32 %v2593_v13, %v1221_v34 }
 0x4ba   :  { %2276 = vtanh.f32 %v1222_v11 }
 0x4bb   :  { %2278 = vrcp.f32 %v1217_v35 }
 0x4c7   :  { %v2277_v48 = vpop.eup %2276 }
 0x4c8   :  { %v1224_v36 = vsub.f32 %v1058_v46, %v2277_v48  ;;  %v2279_v37 = vpop.eup %2278 }
 0x4ca   :  { %v1225_v38 = vmul.f32 %v2279_v37, %v1224_v36 }
 0x4cc   :  { %v1226_v49 = vadd.f32 %v2277_v48, %v1225_v38 }
 0x4ce   :  { %2029 = vmatmul.mubr.msk.f32.vlgmr.msra.gmra.mxu1 %vm60_vm0, %v1226_v49  ;;  %2189 = vmatmul.mubr.msk.f32.vlgmr.msra.gmra.mxu0 %vm60_vm0, %v1226_v49 }
 0x4cf   :  { %1426 = vmatpush1.msra.mxu1 %v2465_v55  ;;  %2192 = vmatpush3.msra.mxu0 %v2536_v7 }
 0x4d0   :  { %1427 = vmatprep.subr.mxu1 %v2473_v57  ;;  %2193 = vmatprep.subr.mxu0 %v2324_v3 }
 0x4d1   :  { %1428 = vmatpush1.msra.mxu1 %v2483_v60  ;;  %2194 = vmatpush3.msra.mxu0 %v2544_v8 }
 0x4d2   :  { %1429 = vmatprep.subr.mxu1 %v2491_v62  ;;  %2195 = vmatprep.subr.mxu0 %v2324_v3 }
 0x4d3   :  { %1430 = vmatpush1.msra.mxu1 %v2503_v1  ;;  %2196 = vmatpush3.msra.mxu0 %v2554_v9 }
 0x4d4   :  { %1431 = vmatprep.subr.mxu1 %v2512_v4  ;;  %2197 = vmatprep.subr.mxu0 %v2324_v3 }
 0x4d5   :  { %1432 = vmatpush1.msra.mxu1 %v2522_v5  ;;  %1465 = vmatprep.mubr.f32.mxu1 %v2324_v3 }
 0x4d6   :  { %2198 = vmatpush3.msra.mxu0 %v2563_v10  ;;  %2199 = vmatprep.mubr.msk.f32.mxu0 %vm2326_vm10, %v2324_v3 }
 0x4d7   :  { %1593 = vmatprep.subr.mxu1 %v2458_v47  ;;  %2202 = vmatprep.subr.mxu0 %v2324_v3 }
 0x58e   :  { %v1299_v13 = vpop.f32.mrf.mxu1  ;;  %v1370_v39 = vpop.f32.mrf.mxu0 }
 0x58f   :  { %v1374_v40 = vadd.f32 %v1299_v13, %v2638_v50  ;;  %v1388_v6 = vadd.f32 %v2608_v31, %v1370_v39 }
 0x590   :  { %v2190_v41 = vpop.f32.mrf.mxu0  ;;  %v1301_v43 = vpop.f32.mrf.mxu1 }
 0x591   :  { %v2031_v42 = vmul.f32 -1.442695, %v1374_v40  ;;  %v1381_v44 = vadd.f32 %v1301_v43, %v2640_v51  ;;  %v1902_v43 = vld [vmem:[%s2815_s6 + $0x18] sm:$0xff] }
 0x593   :  { %2280 = vpow2.f32 %v2031_v42  ;;  %v2032_v61 = vmul.f32 -1.442695, %v1381_v44  ;;  %v1900_v44 = vld [vmem:[%s2815_s6 + $0x8] sm:$0xff] }
 0x595   :  { %2282 = vpow2.f32 %v2032_v61  ;;  %v1899_v61 = vld [vmem:[%s2815_s6] sm:$0xff] }
 0x5a0   :  { %v2281_v63 = vpop.eup %2280 }
 0x5a1   :  { %v1378_v0 = vadd.f32 1.0, %v2281_v63 }
 0x5a2   :  { %v2283_v2 = vpop.eup %2282 }
 0x5a3   :  { %2284 = vrcp.f32 %v1378_v0  ;;  %v1385_v20 = vadd.f32 1.0, %v2283_v2 }
 0x5b0   :  { %v2285_v45 = vpop.eup %2284 }
 0x5b1   :  { %v1389_v12 = vmul.f32 %v2285_v45, %v1388_v6 }
 0x5b3   :  { %v1390_v19 = vadd.f32 %v1389_v12, %v2599_v16 }
 0x5b5   :  { %2286 = vtanh.f32 %v1390_v19 }
 0x5b6   :  { %2288 = vrcp.f32 %v1385_v20 }
 0x5c2   :  { %v2287_v50 = vpop.eup %2286 }
 0x5c3   :  { %v1392_v46 = vsub.f32 %v1226_v49, %v2287_v50  ;;  %v2289_v14 = vpop.eup %2288 }
 0x5c5   :  { %v1393_v21 = vmul.f32 %v2289_v14, %v1392_v46 }
 0x5c7   :  { %v1394_v51 = vadd.f32 %v2287_v50, %v1393_v21 }
 0x5c9   :  { %2033 = vmatmul.mubr.msk.f32.vlgmr.msra.gmra.mxu1 %vm60_vm0, %v1394_v51  ;;  %2200 = vmatmul.mubr.msk.f32.vlgmr.msra.gmra.mxu0 %vm60_vm0, %v1394_v51 }
 0x5ca   :  { %1594 = vmatpush1.msra.mxu1 %v2465_v55  ;;  %2203 = vmatpush3.msra.mxu0 %v2536_v7 }
 0x5cb   :  { %1595 = vmatprep.subr.mxu1 %v2473_v57  ;;  %2204 = vmatprep.subr.mxu0 %v2324_v3 }
 0x5cc   :  { %1596 = vmatpush1.msra.mxu1 %v2483_v60  ;;  %2205 = vmatpush3.msra.mxu0 %v2544_v8 }
 0x5cd   :  { %1597 = vmatprep.subr.mxu1 %v2491_v62  ;;  %2206 = vmatprep.subr.mxu0 %v2324_v3 }
 0x5ce   :  { %1598 = vmatpush1.msra.mxu1 %v2503_v1  ;;  %2207 = vmatpush3.msra.mxu0 %v2554_v9 }
 0x5cf   :  { %1599 = vmatprep.subr.mxu1 %v2512_v4  ;;  %2208 = vmatprep.subr.mxu0 %v2324_v3 }
 0x5d0   :  { %1600 = vmatpush1.msra.mxu1 %v2522_v5  ;;  %1633 = vmatprep.mubr.f32.mxu1 %v2324_v3 }
 0x5d1   :  { %2209 = vmatpush3.msra.mxu0 %v2563_v10  ;;  %2210 = vmatprep.mubr.msk.f32.mxu0 %vm2326_vm10, %v2324_v3 }
 0x5d2   :  { %1761 = vmatprep.subr.mxu1 %v2458_v47  ;;  %2213 = vmatprep.subr.mxu0 %v2324_v3 }
 0x689   :  { %v1467_v16 = vpop.f32.mrf.mxu1  ;;  %v1538_v22 = vpop.f32.mrf.mxu0 }
 0x68a   :  { %v1542_v23 = vadd.f32 %v1467_v16, %v2642_v52  ;;  %v1556_v47 = vadd.f32 %v2608_v31, %v1538_v22 }
 0x68b   :  { %v2201_v24 = vpop.f32.mrf.mxu0  ;;  %v1469_v26 = vpop.f32.mrf.mxu1 }
 0x68c   :  { %v2035_v25 = vmul.f32 -1.442695, %v1542_v23  ;;  %v1549_v27 = vadd.f32 %v1469_v26, %v2644_v53  ;;  %v2045_v26 = vld [vmem:[%s2816_s7] ss:$0 sm:$0xff] }
 0x68e   :  { %2290 = vpow2.f32 %v2035_v25  ;;  %v2036_v28 = vmul.f32 -1.442695, %v1549_v27 }
 0x690   :  { %2292 = vpow2.f32 %v2036_v28 }
 0x69b   :  { %v2291_v29 = vpop.eup %2290 }
 0x69c   :  { %v1546_v30 = vadd.f32 1.0, %v2291_v29 }
 0x69d   :  { %v2293_v32 = vpop.eup %2292 }
 0x69e   :  { %2294 = vrcp.f32 %v1546_v30  ;;  %v1553_v35 = vadd.f32 1.0, %v2293_v32 }
 0x6ab   :  { %v2295_v33 = vpop.eup %2294 }
 0x6ac   :  { %v1557_v34 = vmul.f32 %v2295_v33, %v1556_v47 }
 0x6ae   :  { %v1558_v11 = vadd.f32 %v2597_v15, %v1557_v34 }
 0x6b0   :  { %2296 = vtanh.f32 %v1558_v11 }
 0x6b1   :  { %2298 = vrcp.f32 %v1553_v35 }
 0x6bd   :  { %v2297_v52 = vpop.eup %2296 }
 0x6be   :  { %v1560_v48 = vsub.f32 %v1394_v51, %v2297_v52  ;;  %v2299_v36 = vpop.eup %2298 }
 0x6c0   :  { %v1561_v37 = vmul.f32 %v2299_v36, %v1560_v48 }
 0x6c2   :  { %v1562_v53 = vadd.f32 %v2297_v52, %v1561_v37 }
 0x6c4   :  { %2037 = vmatmul.mubr.msk.f32.vlgmr.msra.gmra.mxu1 %vm60_vm0, %v1562_v53  ;;  %2211 = vmatmul.mubr.msk.f32.vlgmr.msra.gmra.mxu0 %vm60_vm0, %v1562_v53 }
 0x6c5   :  { %1762 = vmatpush1.msra.mxu1 %v2465_v55  ;;  %2214 = vmatpush3.msra.mxu0 %v2536_v7 }
 0x6c6   :  { %1763 = vmatprep.subr.mxu1 %v2473_v57  ;;  %2215 = vmatprep.subr.mxu0 %v2324_v3 }
 0x6c7   :  { %1764 = vmatpush1.msra.mxu1 %v2483_v60  ;;  %2216 = vmatpush3.msra.mxu0 %v2544_v8 }
 0x6c8   :  { %1765 = vmatprep.subr.mxu1 %v2491_v62  ;;  %2217 = vmatprep.subr.mxu0 %v2324_v3 }
 0x6c9   :  { %1766 = vmatpush1.msra.mxu1 %v2503_v1  ;;  %2218 = vmatpush3.msra.mxu0 %v2554_v9 }
 0x6ca   :  { %1767 = vmatprep.subr.mxu1 %v2512_v4  ;;  %2219 = vmatprep.subr.mxu0 %v2324_v3 }
 0x6cb   :  { %1768 = vmatpush1.msra.mxu1 %v2522_v5  ;;  %1801 = vmatprep.mubr.f32.mxu1 %v2324_v3 }
 0x6cc   :  { %2220 = vmatpush3.msra.mxu0 %v2563_v10  ;;  %2221 = vmatprep.mubr.msk.f32.mxu0 %vm2326_vm10, %v2324_v3 }
 0x6cd   :  { %2224 = vmatprep.subr.mxu1 %v2324_v3 }
 0x784   :  { %v1635_v55 = vpop.f32.mrf.mxu1  ;;  %v1706_v57 = vpop.f32.mrf.mxu0 }
 0x785   :  { %v1710_v60 = vadd.f32 %v1635_v55, %v2646_v54  ;;  %v1724_v15 = vadd.f32 %v2608_v31, %v1706_v57 }
 0x786   :  { %v2212_v62 = vpop.f32.mrf.mxu0  ;;  %v1637_v4 = vpop.f32.mrf.mxu1 }
 0x787   :  { %v2039_v1 = vmul.f32 -1.442695, %v1710_v60  ;;  %v1717_v7 = vadd.f32 %v1637_v4, %v2648_v56 }
 0x789   :  { %2300 = vpow2.f32 %v2039_v1  ;;  %v2040_v5 = vmul.f32 -1.442695, %v1717_v7 }
 0x78b   :  { %2302 = vpow2.f32 %v2040_v5 }
 0x796   :  { %v2301_v8 = vpop.eup %2300 }
 0x797   :  { %v1714_v9 = vadd.f32 1.0, %v2301_v8 }
 0x798   :  { %v2303_v10 = vpop.eup %2302 }
 0x799   :  { %2304 = vrcp.f32 %v1714_v9  ;;  %v1721_v39 = vadd.f32 1.0, %v2303_v10 }
 0x7a6   :  { %v2305_v38 = vpop.eup %2304 }
 0x7a7   :  { %v1725_v49 = vmul.f32 %v2305_v38, %v1724_v15 }
 0x7a9   :  { %v1726_v13 = vadd.f32 %v1725_v49, %v2603_v18  ;;  %v1901_v18 = vld [vmem:[%s2815_s6 + $0x10] sm:$0xff] }
 0x7ab   :  { %2306 = vtanh.f32 %v1726_v13 }
 0x7ac   :  { %2308 = vrcp.f32 %v1721_v39 }
 0x7b8   :  { %v2307_v54 = vpop.eup %2306 }
 0x7b9   :  { %v1728_v40 = vsub.f32 %v1562_v53, %v2307_v54  ;;  %v2309_v41 = vpop.eup %2308 }
 0x7bb   :  { %v1729_v42 = vmul.f32 %v2309_v41, %v1728_v40 }
 0x7bd   :  { %v1730_v56 = vadd.f32 %v2307_v54, %v1729_v42 }
 0x7bf   :  { %2041 = vmatmul.mubr.msk.f32.vlgmr.msra.gmra.mxu1 %vm60_vm0, %v1730_v56  ;;  %2222 = vmatmul.mubr.msk.f32.vlgmr.msra.gmra.mxu0 %vm60_vm0, %v1730_v56 }
 0x7c0   :  { %2232 = vmatprep.mubr.msk.f32.mxu1 %vm2326_vm10, %v2324_v3  ;;  %2225 = vmatpush3.msra.mxu1 %v1902_v43 }
 0x7c1   :  { %2226 = vmatprep.subr.mxu1 %v2324_v3 }
 0x7c2   :  { %2227 = vmatpush3.msra.mxu1 %v1901_v18 }
 0x7c3   :  { %2228 = vmatprep.subr.mxu1 %v2324_v3 }
 0x7c4   :  { %2229 = vmatpush3.msra.mxu1 %v1900_v44 }
 0x7c5   :  { %2230 = vmatprep.subr.mxu1 %v2324_v3 }
 0x7c6   :  { %2231 = vmatpush3.msra.mxu1 %v1899_v61 }
 0x87f   :  { %v1803_v63 = vpop.f32.mrf.mxu1  ;;  %v1874_v0 = vpop.f32.mrf.mxu0 }
 0x880   :  { %v1878_v2 = vadd.f32 %v1803_v63, %v2650_v58  ;;  %v1892_v21 = vadd.f32 %v2608_v31, %v1874_v0 }
 0x881   :  { %v2223_v6 = vpop.f32.mrf.mxu0  ;;  %v1805_v12 = vpop.f32.mrf.mxu1 }
 0x882   :  { %v2043_v45 = vmul.f32 -1.442695, %v1878_v2  ;;  %v1885_v19 = vadd.f32 %v1805_v12, %v2652_v59 }
 0x884   :  { %2310 = vpow2.f32 %v2043_v45  ;;  %v2044_v20 = vmul.f32 -1.442695, %v1885_v19 }
 0x886   :  { %2312 = vpow2.f32 %v2044_v20 }
 0x891   :  { %v2311_v50 = vpop.eup %2310 }
 0x892   :  { %v1882_v46 = vadd.f32 1.0, %v2311_v50 }
 0x893   :  { %v2313_v14 = vpop.eup %2312 }
 0x894   :  { %2314 = vrcp.f32 %v1882_v46  ;;  %v1889_v22 = vadd.f32 1.0, %v2313_v14 }
 0x8a1   :  { %v2315_v3 = vpop.eup %2314 }
 0x8a2   :  { %v1893_v51 = vmul.f32 %v2315_v3, %v1892_v21 }
 0x8a4   :  { %v1894_v16 = vadd.f32 %v2601_v17, %v1893_v51 }
 0x8a6   :  { %2316 = vtanh.f32 %v1894_v16 }
 0x8a7   :  { %2318 = vrcp.f32 %v1889_v22 }
 0x8b3   :  { %v2317_v58 = vpop.eup %2316 }
 0x8b4   :  { %v1896_v23 = vsub.f32 %v1730_v56, %v2317_v58  ;;  %v2319_v24 = vpop.eup %2318 }
 0x8b6   :  { %v1897_v25 = vmul.f32 %v2319_v24, %v1896_v23 }
 0x8b8   :  { %v1898_v59 = vadd.f32 %v2317_v58, %v1897_v25 }
 0x8ba   :  { %2233 = vmatmul.mubr.msk.f32.vlgmr.msra.gmra.mxu1 %vm60_vm0, %v1898_v59 }
 0x97a   :  { %v1979_v27 = vpop.f32.mrf.mxu1 }
 0x97b   :  { %v1980_v31 = vadd.f32 %v2045_v26, %v1979_v27 }
 0x97c   :  { %v2234_v28 = vpop.f32.mrf.mxu1 }
 0x97d   :  { %v2047_v29 = vmul.f32 -1.442695, %v1980_v31 }
 0x97f   :  { %2320 = vpow2.f32 %v2047_v29 }
 0x98c   :  { %v2321_v17 = vpop.eup %2320 }
 0x98d   :  { %v1986_v30 = vadd.f32 1.0, %v2321_v17 }
 0x98f   :  { %2322 = vrcp.f32 %v1986_v30 }
 0x99c   :  { %v2323_v32 = vpop.eup %2322 }
 0x99d   :  { %1989 = vst [vmem:[%s2817_s8] sm:$0xff] %v2323_v32 }

</bundles_post_ra>
